<compile_context>
chip_gen: v6e
topology: v6e:2x2x1
jax: 0.10.0
libtpu: 0.0.40
codegen_flags: <defaults>
</compile_context>

<pallas_src>
import functools

import jax
import jax.numpy as jnp
from jax.experimental import pallas as pl
from jax.experimental.pallas import tpu as pltpu

_LANE = 128
_SUBLANE = 8


def _round_up(n, m):
    return ((n + m - 1) // m) * m


def _fused_mlp_kernel(*refs, num_layers, compute_dtype):
    """refs = (x_ref, w0, b0, w1, b1, ..., wL, bL, o_ref).

    The whole layer stack runs inside one kernel body; intermediate activations
    live in vregs/VMEM (compiler managed), never in HBM.
    """
    x_ref = refs[0]
    o_ref = refs[-1]
    wb = refs[1:-1]

    h = x_ref[...].astype(jnp.float32)
    for li in range(num_layers):
        w_ref = wb[2 * li]
        b_ref = wb[2 * li + 1]
        # bf16 operands on the MXU, f32 accumulation.
        y = jnp.dot(
            h.astype(compute_dtype),
            w_ref[...].astype(compute_dtype),
            preferred_element_type=jnp.float32,
        )
        y = y + b_ref[...].astype(jnp.float32)  # f32 bias/epilogue
        if li < num_layers - 1:
            h = jnp.maximum(y, 0.0)  # ReLU; Dropout (eval) = identity
        else:
            h = jax.nn.sigmoid(y)    # final Sigmoid (EUP)
    o_ref[...] = h.astype(o_ref.dtype)


def mlp_forward(x, params, *, compute_dtype=jnp.bfloat16):
    """x: [B, dims[0]] f32.  params: list of (w[din,dout] bf16, b[dout] f32)."""
    B, d0 = x.shape
    num_layers = len(params)

    # Real and lane-padded feature dims for every layer boundary.
    dims_real = [d0] + [w.shape[1] for (w, _) in params]
    dims_pad = [_round_up(d, _LANE) for d in dims_real]

    # Batch tiling: tm is a multiple of 8 sublanes; the batch grid axis is
    # "parallel" so it shards across TensorCores when B is large.
    tm = min(128, _round_up(B, _SUBLANE))
    b_pad = _round_up(B, tm)
    nb = b_pad // tm

    # Pad once in the wrapper (zeros are exactly neutral through Linear/ReLU).
    x_p = jnp.pad(
        x.astype(jnp.float32),
        ((0, b_pad - B), (0, dims_pad[0] - dims_real[0])),
    )
    padded = []
    for li, (w, b) in enumerate(params):
        din_p, dout_p = dims_pad[li], dims_pad[li + 1]
        w_p = jnp.pad(
            w.astype(compute_dtype),
            ((0, din_p - w.shape[0]), (0, dout_p - w.shape[1])),
        )
        b_p = jnp.pad(
            b.astype(jnp.float32).reshape(1, -1),
            ((0, 0), (0, dout_p - b.shape[-1])),
        )
        padded += [w_p, b_p]

    # BlockSpecs: x/out tiled over batch; weights/biases use constant block
    # indices so they are fetched once and stay resident across batch tiles.
    in_specs = [pl.BlockSpec((tm, dims_pad[0]), lambda i: (i, 0))]
    for li in range(num_layers):
        din_p, dout_p = dims_pad[li], dims_pad[li + 1]
        in_specs.append(pl.BlockSpec((din_p, dout_p), lambda i: (0, 0)))
        in_specs.append(pl.BlockSpec((1, dout_p), lambda i: (0, 0)))
    out_specs = pl.BlockSpec((tm, dims_pad[-1]), lambda i: (i, 0))

    flops = 2 * b_pad * sum(
        dims_pad[i] * dims_pad[i + 1] for i in range(num_layers)
    )
    bytes_accessed = (
        int(x_p.size) * 4
        + sum(int(a.size) * int(a.dtype.itemsize) for a in padded)
        + b_pad * dims_pad[-1] * 4
    )
    cost = pl.CostEstimate(
        flops=flops,
        transcendentals=b_pad * dims_pad[-1],  # sigmoid exp
        bytes_accessed=bytes_accessed,
    )

    kernel = functools.partial(
        _fused_mlp_kernel, num_layers=num_layers, compute_dtype=compute_dtype
    )

    out_p = pl.pallas_call(
        kernel,
        out_shape=jax.ShapeDtypeStruct((b_pad, dims_pad[-1]), jnp.float32),
        grid_spec=pltpu.PrefetchScalarGridSpec(
            num_scalar_prefetch=0,
            grid=(nb,),
            in_specs=in_specs,
            out_specs=out_specs,
        ),
        compiler_params=pltpu.CompilerParams(
            dimension_semantics=("parallel",),
            vmem_limit_bytes=32 * 1024 * 1024,  # explicit; fits v5e/v6e/v7x
        ),
        cost_estimate=cost,
    )(x_p, *padded)

    # Single slice at the end: drop batch padding and the padded output lanes.
    return out_p[:B, : dims_real[-1]]


def init_mlp_params(key, dims, *, weight_dtype=jnp.bfloat16):
    """PyTorch nn.Linear default init U(-1/sqrt(fan_in), 1/sqrt(fan_in)).

    Weights stored transposed ([in, out]) and in bf16 (MXU operand dtype);
    biases kept in f32 (f32 epilogue).
    """
    params = []
    layer_dims = list(zip(dims[:-1], dims[1:])) + [(dims[-1], 1)]
    for (din, dout) in layer_dims:
        key, kw, kb = jax.random.split(key, 3)
        bound = 1.0 / (din ** 0.5)
        w = jax.random.uniform(kw, (din, dout), jnp.float32, -bound, bound)
        b = jax.random.uniform(kb, (dout,), jnp.float32, -bound, bound)
        params.append((w.astype(weight_dtype), b))
    return params


def mlp_reference(x, params, compute_dtype=jnp.bfloat16):
    """Pure-JAX reference emulating the kernel's bf16 operand rounding."""
    h = x.astype(jnp.float32)
    for li, (w, b) in enumerate(params):
        hq = h.astype(compute_dtype).astype(jnp.float32)
        wq = w.astype(compute_dtype).astype(jnp.float32)
        y = hq @ wq + b.astype(jnp.float32).reshape(1, -1)
        if li < len(params) - 1:
            h = jnp.maximum(y, 0.0)
        else:
            h = jax.nn.sigmoid(y)
    return h


if __name__ == "__main__":
    info = {"dims": [32, 64, 32], "dropout": 0.1}
    batch = 8

    key = jax.random.PRNGKey(0)
    key, kx = jax.random.split(key)
    x = jax.random.normal(kx, (batch, info["dims"][0]), jnp.float32)

    params = init_mlp_params(key, info["dims"])

    out = jax.block_until_ready(mlp_forward(x, params))
    ref = mlp_reference(x, params)

    assert out.shape == (batch, 1), out.shape
    assert jnp.allclose(out, ref, atol=2e-5, rtol=1e-4), float(
        jnp.max(jnp.abs(out - ref))
    )

    print("KERNEL_OK")
</pallas_src>

<mosaic_0001>
module attributes {stable_mosaic.version = 11 : i64} {
  func.func @_fused_mlp_kernel(%arg0: i32, %arg1: memref<8x128xf32, #tpu.memory_space<vmem>>, %arg2: memref<128x128xbf16, #tpu.memory_space<vmem>>, %arg3: memref<1x128xf32, #tpu.memory_space<vmem>>, %arg4: memref<128x128xbf16, #tpu.memory_space<vmem>>, %arg5: memref<1x128xf32, #tpu.memory_space<vmem>>, %arg6: memref<128x128xbf16, #tpu.memory_space<vmem>>, %arg7: memref<1x128xf32, #tpu.memory_space<vmem>>, %arg8: memref<8x128xf32, #tpu.memory_space<vmem>>) attributes {dimension_semantics = [#tpu.dimension_semantics<parallel>], iteration_bounds = array<i64: 1>, scalar_prefetch = 0 : i64, scratch_operands = 0 : i64, tpu.core_type = #tpu.core_type<tc>, window_params = [{transform_indices = @transform_0, window_bounds = array<i64: 8, 128>}, {pipeline_mode = #tpu.pipeline_mode<synchronous>, transform_indices = @transform_1, window_bounds = array<i64: 128, 128>}, {pipeline_mode = #tpu.pipeline_mode<synchronous>, transform_indices = @transform_2, window_bounds = array<i64: 1, 128>}, {pipeline_mode = #tpu.pipeline_mode<synchronous>, transform_indices = @transform_3, window_bounds = array<i64: 128, 128>}, {pipeline_mode = #tpu.pipeline_mode<synchronous>, transform_indices = @transform_4, window_bounds = array<i64: 1, 128>}, {pipeline_mode = #tpu.pipeline_mode<synchronous>, transform_indices = @transform_5, window_bounds = array<i64: 128, 128>}, {pipeline_mode = #tpu.pipeline_mode<synchronous>, transform_indices = @transform_6, window_bounds = array<i64: 1, 128>}, {transform_indices = @transform_7, window_bounds = array<i64: 8, 128>}]} {
    %c0 = arith.constant 0 : index
    %c0_0 = arith.constant 0 : index
    %0 = vector.load %arg1[%c0, %c0_0] : memref<8x128xf32, #tpu.memory_space<vmem>>, vector<8x128xf32>
    %1 = arith.truncf %0 : vector<8x128xf32> to vector<8x128xbf16>
    %c0_1 = arith.constant 0 : index
    %c0_2 = arith.constant 0 : index
    %2 = vector.load %arg2[%c0_1, %c0_2] : memref<128x128xbf16, #tpu.memory_space<vmem>>, vector<128x128xbf16>
    %cst = arith.constant dense<0.000000e+00> : vector<8x128xf32>
    %3 = tpu.matmul %1, %2, %cst {dimension_numbers = #tpu.dot_dimension_numbers<[1], [0], [0], [1], [0, 0, 1, 1], [], []>} : vector<8x128xbf16>, vector<128x128xbf16>, vector<8x128xf32> -> vector<8x128xf32>
    %c0_3 = arith.constant 0 : index
    %c0_4 = arith.constant 0 : index
    %4 = vector.load %arg3[%c0_3, %c0_4] : memref<1x128xf32, #tpu.memory_space<vmem>>, vector<1x128xf32>
    %5 = vector.broadcast %4 : vector<1x128xf32> to vector<8x128xf32>
    %6 = arith.addf %3, %5 : vector<8x128xf32>
    %cst_5 = arith.constant 0.000000e+00 : f32
    %7 = vector.broadcast %cst_5 : f32 to vector<8x128xf32>
    %8 = arith.maximumf %6, %7 : vector<8x128xf32>
    %9 = arith.truncf %8 : vector<8x128xf32> to vector<8x128xbf16>
    %c0_6 = arith.constant 0 : index
    %c0_7 = arith.constant 0 : index
    %10 = vector.load %arg4[%c0_6, %c0_7] : memref<128x128xbf16, #tpu.memory_space<vmem>>, vector<128x128xbf16>
    %cst_8 = arith.constant dense<0.000000e+00> : vector<8x128xf32>
    %11 = tpu.matmul %9, %10, %cst_8 {dimension_numbers = #tpu.dot_dimension_numbers<[1], [0], [0], [1], [0, 0, 1, 1], [], []>} : vector<8x128xbf16>, vector<128x128xbf16>, vector<8x128xf32> -> vector<8x128xf32>
    %c0_9 = arith.constant 0 : index
    %c0_10 = arith.constant 0 : index
    %12 = vector.load %arg5[%c0_9, %c0_10] : memref<1x128xf32, #tpu.memory_space<vmem>>, vector<1x128xf32>
    %13 = vector.broadcast %12 : vector<1x128xf32> to vector<8x128xf32>
    %14 = arith.addf %11, %13 : vector<8x128xf32>
    %cst_11 = arith.constant 0.000000e+00 : f32
    %15 = vector.broadcast %cst_11 : f32 to vector<8x128xf32>
    %16 = arith.maximumf %14, %15 : vector<8x128xf32>
    %17 = arith.truncf %16 : vector<8x128xf32> to vector<8x128xbf16>
    %c0_12 = arith.constant 0 : index
    %c0_13 = arith.constant 0 : index
    %18 = vector.load %arg6[%c0_12, %c0_13] : memref<128x128xbf16, #tpu.memory_space<vmem>>, vector<128x128xbf16>
    %cst_14 = arith.constant dense<0.000000e+00> : vector<8x128xf32>
    %19 = tpu.matmul %17, %18, %cst_14 {dimension_numbers = #tpu.dot_dimension_numbers<[1], [0], [0], [1], [0, 0, 1, 1], [], []>} : vector<8x128xbf16>, vector<128x128xbf16>, vector<8x128xf32> -> vector<8x128xf32>
    %c0_15 = arith.constant 0 : index
    %c0_16 = arith.constant 0 : index
    %20 = vector.load %arg7[%c0_15, %c0_16] : memref<1x128xf32, #tpu.memory_space<vmem>>, vector<1x128xf32>
    %21 = vector.broadcast %20 : vector<1x128xf32> to vector<8x128xf32>
    %22 = arith.addf %19, %21 : vector<8x128xf32>
    %23 = arith.negf %22 : vector<8x128xf32>
    %24 = math.exp %23 : vector<8x128xf32>
    %cst_17 = arith.constant 1.000000e+00 : f32
    %25 = vector.broadcast %cst_17 : f32 to vector<8x128xf32>
    %26 = arith.addf %25, %24 : vector<8x128xf32>
    %27 = arith.divf %25, %26 : vector<8x128xf32>
    %c0_18 = arith.constant 0 : index
    %c0_19 = arith.constant 0 : index
    %28 = vector.load %arg8[%c0_18, %c0_19] : memref<8x128xf32, #tpu.memory_space<vmem>>, vector<8x128xf32>
    tpu.vector_store %arg8[%c0_18, %c0_19], %27 {strides = array<i32>} : memref<8x128xf32, #tpu.memory_space<vmem>>, vector<8x128xf32>,
    return
  }
  func.func @transform_0(%arg0: i32) -> (i32, i32) {
    %c0_i32 = arith.constant 0 : i32
    %c0_i32_0 = arith.constant 0 : i32
    return %arg0, %c0_i32 : i32, i32
  }
  func.func @transform_1(%arg0: i32) -> (i32, i32) {
    %c0_i32 = arith.constant 0 : i32
    %c0_i32_0 = arith.constant 0 : i32
    %c0_i32_1 = arith.constant 0 : i32
    return %c0_i32, %c0_i32_0 : i32, i32
  }
  func.func @transform_2(%arg0: i32) -> (i32, i32) {
    %c0_i32 = arith.constant 0 : i32
    %c0_i32_0 = arith.constant 0 : i32
    %c0_i32_1 = arith.constant 0 : i32
    return %c0_i32, %c0_i32_0 : i32, i32
  }
  func.func @transform_3(%arg0: i32) -> (i32, i32) {
    %c0_i32 = arith.constant 0 : i32
    %c0_i32_0 = arith.constant 0 : i32
    %c0_i32_1 = arith.constant 0 : i32
    return %c0_i32, %c0_i32_0 : i32, i32
  }
  func.func @transform_4(%arg0: i32) -> (i32, i32) {
    %c0_i32 = arith.constant 0 : i32
    %c0_i32_0 = arith.constant 0 : i32
    %c0_i32_1 = arith.constant 0 : i32
    return %c0_i32, %c0_i32_0 : i32, i32
  }
  func.func @transform_5(%arg0: i32) -> (i32, i32) {
    %c0_i32 = arith.constant 0 : i32
    %c0_i32_0 = arith.constant 0 : i32
    %c0_i32_1 = arith.constant 0 : i32
    return %c0_i32, %c0_i32_0 : i32, i32
  }
  func.func @transform_6(%arg0: i32) -> (i32, i32) {
    %c0_i32 = arith.constant 0 : i32
    %c0_i32_0 = arith.constant 0 : i32
    %c0_i32_1 = arith.constant 0 : i32
    return %c0_i32, %c0_i32_0 : i32, i32
  }
  func.func @transform_7(%arg0: i32) -> (i32, i32) {
    %c0_i32 = arith.constant 0 : i32
    %c0_i32_0 = arith.constant 0 : i32
    return %arg0, %c0_i32 : i32, i32
  }
}

</mosaic_0001>

<bundles_post_ra>
// kernel: tpu_custom_call.1
= control target key start
LH: loop header
LB: loop body
LE: loop exit
PB: predicated region body
PF: predicated region fallthrough
CT: control target
= control target key end

     0   :  { %12 = vsyncpa [#allocation3], 0  ;;  %s816_s0 = inlined_call_operand.hbm [shape: f32[8,128], index: 0, kind: input, shape index: {}]   ;;  %s817_s1 = inlined_call_operand.hbm [shape: bf16[128,128], index: 1, kind: input, shape index: {}]   ;;  %s818_s2 = inlined_call_operand.vmem [shape: f32[1,128], index: 2, kind: input, shape index: {}]   ;;  %s819_s3 = inlined_call_operand.hbm [shape: bf16[128,128], index: 3, kind: input, shape index: {}]   ;;  %s820_s4 = inlined_call_operand.vmem [shape: f32[1,128], index: 4, kind: input, shape index: {}]   ;;  %s821_s5 = inlined_call_operand.hbm [shape: bf16[128,128], index: 5, kind: input, shape index: {}]   ;;  %s822_s6 = inlined_call_operand.vmem [shape: f32[1,128], index: 6, kind: input, shape index: {}]   ;;  %s823_s7 = inlined_call_operand.hbm [shape: f32[8,128], index: 7, kind: output, shape index: {}]  }
   0x1   :  { %13 = vsyncpa [#allocation6], 0 }
   0x2   :  { %14 = vsyncpa [#allocation9], 0 }
   0x3   :  { %15 = vsyncpa [#allocation4], 0  ;;  %s704_s24 = smov [#allocation5]  }
   0x4   :  { %s31_s25 = sshll.u32 %s704_s24, 4  ;;  %s32_s25 = int_to_ptr.vmem [resolvable:$true] %s31_s25 }
   0x5   :  { %s604_s26 = scalar_lea.vmem %s32_s25, 1024  ;;  %p609_p1 = scmp.lt.s32.totalorder %s32_s25, %s32_s25 }
   0x6   :  { %p605_p0 = scmp.ne.s32.totalorder %s32_s25, %s604_s26  ;;  %p610_p2 = scmp.lt.s32.totalorder %s604_s26, %s604_s26 }
   0x8   :  { %p611_p3 = por %p610_p2, %p609_p1 }
   0xa   :  { %p612_p4 = pnand %p611_p3, %p605_p0 }
   0xc   :  { %615 = shalt.err (!%p612_p4)
}
   0xd   :  { %s705_s27 = smov 64   ;;  %s706_s28 = smov 4  }
   0xe   :  { %37 = dma.hbm_to_vmem [thread:$0]  %s817_s1, 1024, %s32_s25, [#allocation6], %s705_s27, %s705_s27, %s706_s28  }
   0xf   :  { %s707_s8 = smov [#allocation2]   ;;  %s708_s10 = smov [#allocation7]  }
  0x10   :  { %s22_s9 = sshll.u32 %s707_s8, 4  ;;  %s45_s11 = sshll.u32 %s708_s10, 4  ;;  %s23_s9 = int_to_ptr.vmem [resolvable:$true] %s22_s9  ;;  %s46_s11 = int_to_ptr.vmem [resolvable:$true] %s45_s11 }
  0x11   :  { %s624_s12 = scalar_lea.vmem %s23_s9, 128  ;;  %p629_p6 = scmp.lt.s32.totalorder %s23_s9, %s23_s9 }
  0x12   :  { %p625_p5 = scmp.ne.s32.totalorder %s23_s9, %s624_s12  ;;  %p630_p7 = scmp.lt.s32.totalorder %s624_s12, %s624_s12 }
  0x14   :  { %p631_p8 = por %p630_p7, %p629_p6 }
  0x16   :  { %p632_p9 = pnand %p631_p8, %p625_p5 }
  0x18   :  { %635 = shalt.err (!%p632_p9)
}
  0x19   :  { %25 = dma.hbm_to_vmem [thread:$0]  %s816_s0, 128, %s23_s9, [#allocation3]  }
  0x1a   :  { %s644_s15 = scalar_lea.vmem %s46_s11, 1024  ;;  %p649_p11 = scmp.lt.s32.totalorder %s46_s11, %s46_s11 }
  0x1b   :  { %p645_p10 = scmp.ne.s32.totalorder %s46_s11, %s644_s15  ;;  %p650_p12 = scmp.lt.s32.totalorder %s644_s15, %s644_s15 }
  0x1d   :  { %p651_p13 = por %p650_p12, %p649_p11 }
  0x1f   :  { %p652_p0 = pnand %p651_p13, %p645_p10 }
  0x21   :  { %655 = shalt.err (!%p652_p0)
}
  0x22   :  { %51 = dma.hbm_to_vmem [thread:$0]  %s819_s3, 1024, %s46_s11, [#allocation6], %s705_s27, %s705_s27, %s706_s28  }
  0x23   :  { %s709_s17 = smov [#allocation8]  }
  0x24   :  { %s59_s18 = sshll.u32 %s709_s17, 4  ;;  %s60_s18 = int_to_ptr.vmem [resolvable:$true] %s59_s18 }
  0x25   :  { %s664_s19 = scalar_lea.vmem %s60_s18, 1024  ;;  %p669_p2 = scmp.lt.s32.totalorder %s60_s18, %s60_s18 }
  0x26   :  { %p665_p1 = scmp.ne.s32.totalorder %s60_s18, %s664_s19  ;;  %p670_p3 = scmp.lt.s32.totalorder %s664_s19, %s664_s19 }
  0x28   :  { %p671_p4 = por %p670_p3, %p669_p2 }
  0x2a   :  { %p672_p5 = pnand %p671_p4, %p665_p1 }
  0x2c   :  { %675 = shalt.err (!%p672_p5)
}
  0x2d   :  { %65 = dma.hbm_to_vmem [thread:$0]  %s821_s5, 1024, %s60_s18, [#allocation9], %s705_s27, %s705_s27, %s706_s28  }
  0x2e   :  { %696 = dma.done.wait [#allocation3], 128  }
  0x2f   :  { %697 = vsyncadd [#allocation3], 4294967168 }
  0x30   :  { %698 = dma.done.wait [#allocation6], 2048  }
  0x31   :  { %699 = vsyncadd [#allocation6], 4294965248 }
  0x32   :  { %700 = dma.done.wait [#allocation9], 1024  }
  0x33   :  { %701 = vsyncadd [#allocation9], 4294966272  ;;  %v710_v0 = vmov 0.0   ;;  %vm711_vm0 = vmmov 0   ;;  %v568_v1 = vld [vmem:[#allocation5 + $0x38] sm:$0xff]   ;;  %v569_v2 = vld [vmem:[#allocation5 + $0x30] sm:$0xff]  }
  0x34   :  { %499 = vmatprep.subr.bf16.mxu0 %v710_v0  ;;  %515 = vmatprep.mubr.msk.bf16.mxu0 %vm711_vm0, %v710_v0  ;;  %v570_v3 = vld [vmem:[#allocation5 + $0x28] sm:$0xff]   ;;  %v576_v4 = vld [vmem:[#allocation7 + $0x38] sm:$0xff]   ;;  %v571_v5 = vld [vmem:[#allocation5 + $0x20] sm:$0xff]  }
  0x35   :  { %519 = vmatprep.subr.bf16.mxu1 %v710_v0  ;;  %535 = vmatprep.mubr.msk.bf16.mxu1 %vm711_vm0, %v710_v0  ;;  %v577_v6 = vld [vmem:[#allocation7 + $0x30] sm:$0xff]   ;;  %v572_v7 = vld [vmem:[#allocation5 + $0x18] sm:$0xff]   ;;  %v578_v8 = vld [vmem:[#allocation7 + $0x28] sm:$0xff]  }
  0x36   :  { %500 = vmatpush3.bf16.msra.mxu0 %v568_v1  ;;  %520 = vmatpush3.bf16.msra.mxu1 %v576_v4  ;;  %v573_v9 = vld [vmem:[#allocation5 + $0x10] sm:$0xff]   ;;  %v579_v10 = vld [vmem:[#allocation7 + $0x20] sm:$0xff]   ;;  %v574_v11 = vld [vmem:[#allocation5 + $0x8] sm:$0xff]  }
  0x37   :  { %501 = vmatprep.subr.bf16.mxu0 %v710_v0  ;;  %521 = vmatprep.subr.bf16.mxu1 %v710_v0  ;;  %v580_v12 = vld [vmem:[#allocation7 + $0x18] sm:$0xff]   ;;  %v575_v13 = vld [vmem:[#allocation5] sm:$0xff]   ;;  %v581_v15 = vld [vmem:[#allocation7 + $0x10] sm:$0xff]  }
  0x38   :  { %v81_v14 = vld [vmem:[#allocation2] sm:$0xff]  ;;  %v582_v17 = vld [vmem:[#allocation7 + $0x8] sm:$0xff]   ;;  %v583_v18 = vld [vmem:[#allocation7] sm:$0xff]  }
  0x39   :  { %v82_v16 = vpack.c.bf16 %v81_v14, %v81_v14  ;;  %v584_v19 = vld [vmem:[#allocation8 + $0x38] sm:$0xff]   ;;  %v585_v20 = vld [vmem:[#allocation8 + $0x30] sm:$0xff]   ;;  %v586_v21 = vld [vmem:[#allocation8 + $0x28] sm:$0xff]  }
  0x3a   :  { %502 = vmatpush3.bf16.msra.mxu0 %v569_v2  ;;  %522 = vmatpush3.bf16.msra.mxu1 %v577_v6  ;;  %v587_v22 = vld [vmem:[#allocation8 + $0x20] sm:$0xff]   ;;  %v588_v23 = vld [vmem:[#allocation8 + $0x18] sm:$0xff]   ;;  %v589_v24 = vld [vmem:[#allocation8 + $0x10] sm:$0xff]  }
  0x3b   :  { %503 = vmatprep.subr.bf16.mxu0 %v710_v0  ;;  %523 = vmatprep.subr.bf16.mxu1 %v710_v0  ;;  %v444_v25 = vld [vmem:[%s818_s2] ss:$0 sm:$0xff]  ;;  %v590_v33 = vld [vmem:[#allocation8 + $0x8] sm:$0xff]   ;;  %v591_v34 = vld [vmem:[#allocation8] sm:$0xff]  }
  0x3c   :  { %v453_v35 = vld [vmem:[%s820_s4] ss:$0 sm:$0xff]  ;;  %s712_s4 = smov [#allocation10]  }
  0x3d   :  { %v462_v43 = vld [vmem:[%s822_s6] ss:$0 sm:$0xff]  ;;  %s433_s24 = sshll.u32 %s712_s4, 4  ;;  %s434_s24 = int_to_ptr.vmem [resolvable:$true] %s433_s24 }
  0x3e   :  { %504 = vmatpush3.bf16.msra.mxu0 %v570_v3  ;;  %524 = vmatpush3.bf16.msra.mxu1 %v578_v8  ;;  %s676_s25 = scalar_lea.vmem %s434_s24, 128  ;;  %p681_p7 = scmp.lt.s32.totalorder %s434_s24, %s434_s24 }
  0x3f   :  { %505 = vmatprep.subr.bf16.mxu0 %v710_v0  ;;  %525 = vmatprep.subr.bf16.mxu1 %v710_v0  ;;  %p677_p6 = scmp.ne.s32.totalorder %s434_s24, %s676_s25  ;;  %p682_p8 = scmp.lt.s32.totalorder %s676_s25, %s676_s25 }
  0x41   :  { %p683_p9 = por %p682_p8, %p681_p7 }
  0x42   :  { %506 = vmatpush3.bf16.msra.mxu0 %v571_v5  ;;  %526 = vmatpush3.bf16.msra.mxu1 %v579_v10 }
  0x43   :  { %507 = vmatprep.subr.bf16.mxu0 %v710_v0  ;;  %527 = vmatprep.subr.bf16.mxu1 %v710_v0  ;;  %p684_p10 = pnand %p683_p9, %p677_p6 }
  0x46   :  { %508 = vmatpush3.bf16.msra.mxu0 %v572_v7  ;;  %528 = vmatpush3.bf16.msra.mxu1 %v580_v12 }
  0x47   :  { %509 = vmatprep.subr.bf16.mxu0 %v710_v0  ;;  %529 = vmatprep.subr.bf16.mxu1 %v710_v0 }
  0x4a   :  { %510 = vmatpush3.bf16.msra.mxu0 %v573_v9  ;;  %530 = vmatpush3.bf16.msra.mxu1 %v581_v15 }
  0x4b   :  { %511 = vmatprep.subr.bf16.mxu0 %v710_v0  ;;  %531 = vmatprep.subr.bf16.mxu1 %v710_v0 }
  0x4e   :  { %512 = vmatpush3.bf16.msra.mxu0 %v574_v11  ;;  %532 = vmatpush3.bf16.msra.mxu1 %v582_v17 }
  0x4f   :  { %513 = vmatprep.subr.bf16.mxu0 %v710_v0  ;;  %533 = vmatprep.subr.bf16.mxu1 %v710_v0 }
  0x52   :  { %514 = vmatpush3.bf16.msra.mxu0 %v575_v13  ;;  %534 = vmatpush3.bf16.msra.mxu1 %v583_v18 }
  0x53   :  { %539 = vmatprep.subr.bf16.mxu0 %v710_v0 }
  0x55   :  { %516 = vmatmul.mubr.bf16.vlgmr.msra.gmra.mxu0 %v82_v16 }
  0x56   :  { %555 = vmatprep.mubr.msk.bf16.mxu0 %vm711_vm0, %v710_v0  ;;  %540 = vmatpush3.bf16.msra.mxu0 %v584_v19 }
  0x57   :  { %541 = vmatprep.subr.bf16.mxu0 %v710_v0 }
  0x5a   :  { %542 = vmatpush3.bf16.msra.mxu0 %v585_v20 }
  0x5b   :  { %543 = vmatprep.subr.bf16.mxu0 %v710_v0 }
  0x5e   :  { %544 = vmatpush3.bf16.msra.mxu0 %v586_v21 }
  0x5f   :  { %545 = vmatprep.subr.bf16.mxu0 %v710_v0 }
  0x62   :  { %546 = vmatpush3.bf16.msra.mxu0 %v587_v22 }
  0x63   :  { %547 = vmatprep.subr.bf16.mxu0 %v710_v0 }
  0x66   :  { %548 = vmatpush3.bf16.msra.mxu0 %v588_v23 }
  0x67   :  { %549 = vmatprep.subr.bf16.mxu0 %v710_v0 }
  0x6a   :  { %550 = vmatpush3.bf16.msra.mxu0 %v589_v24 }
  0x6b   :  { %551 = vmatprep.subr.bf16.mxu0 %v710_v0 }
  0x6e   :  { %552 = vmatpush3.bf16.msra.mxu0 %v590_v33 }
  0x6f   :  { %553 = vmatprep.subr.bf16.mxu0 %v710_v0 }
  0x72   :  { %554 = vmatpush3.bf16.msra.mxu0 %v591_v34 }
 0x115   :  { %v188_v26 = vpop.f32.mrf.mxu0 }
 0x116   :  { %v189_v27 = vadd.f32 %v444_v25, %v188_v26 }
 0x117   :  { %v517_v28 = vpop.f32.mrf.mxu0 }
 0x118   :  { %v194_v29 = vmax.f32 %v189_v27, 0.0 }
 0x119   :  { %v191_v30 = vpop.f32.mrf.mxu0 }
 0x11a   :  { %v195_v31 = vpack.c.bf16 %v194_v29, %v194_v29 }
 0x11b   :  { %v518_v32 = vpop.f32.mrf.mxu0 }
 0x11c   :  { %536 = vmatmul.mubr.bf16.vlgmr.msra.gmra.mxu1 %v195_v31 }
 0x1dc   :  { %v301_v36 = vpop.f32.mrf.mxu1 }
 0x1dd   :  { %v302_v37 = vadd.f32 %v453_v35, %v301_v36 }
 0x1de   :  { %v537_v38 = vpop.f32.mrf.mxu1 }
 0x1df   :  { %v307_v39 = vmax.f32 %v302_v37, 0.0 }
 0x1e0   :  { %v304_v40 = vpop.f32.mrf.mxu1 }
 0x1e1   :  { %v308_v41 = vpack.c.bf16 %v307_v39, %v307_v39 }
 0x1e2   :  { %v538_v42 = vpop.f32.mrf.mxu1 }
 0x1e3   :  { %556 = vmatmul.mubr.bf16.vlgmr.msra.gmra.mxu0 %v308_v41 }
 0x2a3   :  { %v414_v44 = vpop.f32.mrf.mxu0 }
 0x2a4   :  { %v415_v45 = vadd.f32 %v462_v43, %v414_v44 }
 0x2a5   :  { %v557_v46 = vpop.f32.mrf.mxu0 }
 0x2a6   :  { %v471_v47 = vmul.f32 -1.442695, %v415_v45 }
 0x2a7   :  { %v417_v48 = vpop.f32.mrf.mxu0 }
 0x2a8   :  { %592 = vpow2.f32 %v471_v47 }
 0x2a9   :  { %v558_v49 = vpop.f32.mrf.mxu0 }
 0x2b5   :  { %v593_v50 = vpop.eup %592 }
 0x2b6   :  { %v423_v51 = vadd.f32 1.0, %v593_v50 }
 0x2b8   :  { %594 = vrcp.f32 %v423_v51 }
 0x2c5   :  { %v595_v52 = vpop.eup %594 }
 0x2c6   :  { %426 = vst [vmem:[#allocation10] sm:$0xff] %v595_v52 }
 0x2c7   :  { %687 = shalt.err (!%p684_p10)
}
 0x2c8   :  { %436 = dma.vmem_to_hbm [thread:$0]  %s434_s24, 128, %s823_s7, [#allocation4]  }
 0x2c9   :  { %702 = dma.done.wait [#allocation4], 128  }
 0x2ca   :  { %703 = vsyncadd [#allocation4], 4294967168 }
 0x2cb   :  { %440 = vsyncpa [#allocation3], 1 }
 0x2cc   :  { %441 = vsyncpa [#allocation6], 1 }
 0x2cd   :  { %442 = vsyncpa [#allocation9], 1 }
 0x2ce   :  { %443 = vsyncpa [#allocation4], 1 }

</bundles_post_ra>
